<compile_context>
chip_gen: v6e
topology: v6e:2x2x1
jax: 0.10.0
libtpu: 0.0.40
codegen_flags: <defaults>
</compile_context>

<pallas_src>
import functools

import numpy as np
import jax
import jax.numpy as jnp
from jax.experimental import pallas as pl
from jax.experimental.pallas import tpu as pltpu

_LANE = 128
_TM_CANDIDATES = (512, 256, 128, 64, 32, 16, 8)   # sublane rows per grid step


def _choose_tm(n):
    """Points per grid step = TM * 128.  Prefer the largest tile that still
    gives >= 2 grid steps (so v7x's two TensorCores both get work); tiny
    clouds run as a single TM=8 step."""
    for tm in _TM_CANDIDATES:
        if pl.cdiv(n, tm * _LANE) >= 2:
            return tm
    return 8


# ----------------------------------------------------------------------------
# host: deterministic parameter construction (mirrors EulerModel.__init__ /
# construct_rotation_matrix with convention 'ZYX': R = Rz(yaw) Ry(pitch) Rx(roll))
# ----------------------------------------------------------------------------
def euler_zyx_to_matrix(yaw, pitch, roll):
    cz, sz = np.cos(yaw), np.sin(yaw)
    cy, sy = np.cos(pitch), np.sin(pitch)
    cx, sx = np.cos(roll), np.sin(roll)
    Rz = np.array([[cz, -sz, 0.0], [sz, cz, 0.0], [0.0, 0.0, 1.0]], np.float32)
    Ry = np.array([[cy, 0.0, sy], [0.0, 1.0, 0.0], [-sy, 0.0, cy]], np.float32)
    Rx = np.array([[1.0, 0.0, 0.0], [0.0, cx, -sx], [0.0, sx, cx]], np.float32)
    return (Rz @ Ry @ Rx).astype(np.float32)


def _fold_coefficients(projection_matrix, rot_param, translation_param,
                       depth_scaling_factor):
    """Fold extrinsics + projection + depth scale into one 4x4 matrix C so
    [u, v, w, depth] = C @ [x, y, z, 1]."""
    # TODO(synk): folding trainable rot/translation params into host numpy is
    # inference-only; it breaks differentiability w.r.t. the parameters.
    R = euler_zyx_to_matrix(*np.asarray(rot_param, np.float32))
    Tr = np.hstack([R, np.asarray(translation_param, np.float32)[:, None]])  # (3,4)
    P = np.asarray(projection_matrix, np.float32).reshape(3, 4)
    C = np.zeros((4, 4), np.float32)
    C[:3, :3] = P[:, :3] @ Tr[:, :3]
    C[:3, 3] = P[:, :3] @ Tr[:, 3] + P[:, 3]
    C[3, :3] = float(depth_scaling_factor) * Tr[2, :3]
    C[3, 3] = float(depth_scaling_factor) * Tr[2, 3]
    return C.reshape(-1)  # 16 coefficients, row-major (u, v, w, depth)


# ----------------------------------------------------------------------------
# Pallas kernel
# ----------------------------------------------------------------------------
def _project_kernel(c_ref, x_ref, o_ref, *, img_w, img_h):
    # c_ref: SMEM (16,) folded coefficients.
    # x_ref: VMEM (3, TM, 128)  -> per-channel dense (TM, 128) tiles [x, y, z].
    # o_ref: VMEM (4, TM, 128)  -> [px, py, depth, fov] (fov as exact 1.0/0.0).
    xs = x_ref[0]
    ys = x_ref[1]
    zs = x_ref[2]

    # VPU broadcast-FMAs with SMEM scalar coefficients; homogeneous '1' folded
    # into the additive constant.
    u = c_ref[0] * xs + c_ref[1] * ys + c_ref[2] * zs + c_ref[3]
    v = c_ref[4] * xs + c_ref[5] * ys + c_ref[6] * zs + c_ref[7]
    w = c_ref[8] * xs + c_ref[9] * ys + c_ref[10] * zs + c_ref[11]
    d = c_ref[12] * xs + c_ref[13] * ys + c_ref[14] * zs + c_ref[15]

    # Perspective divide via EUP reciprocal + one Newton step (near f32-exact).
    # NOTE: padded lanes (x=y=z=0) may give w ~ 0 -> inf/nan in px/py; the
    # wrapper slices them off before any use.
    inv_w = pl.reciprocal(w, approx=True)
    inv_w = inv_w * (2.0 - w * inv_w)
    px = u * inv_w
    py = v * inv_w

    # FOV mask (padded lanes have xs == 0 and fail xs > 2, so fov = 0 there).
    fov = ((px < img_w - 1.0) & (px >= 0.0) &
           (py < img_h - 1.0) & (py >= 0.0) &
           (xs > 2.0)).astype(jnp.float32)

    # Per-channel full-tile unmasked stores — no sublane concat / relayout.
    o_ref[0] = px
    o_ref[1] = py
    o_ref[2] = d
    o_ref[3] = fov


def _run_projection(coeffs, X, image_height, image_width, tm):
    # X: (3, n_blocks, 128) with n_blocks % tm == 0.
    n_blocks = X.shape[1]
    kernel = functools.partial(
        _project_kernel, img_w=float(image_width), img_h=float(image_height))
    return pl.pallas_call(
        kernel,
        out_shape=jax.ShapeDtypeStruct((4, n_blocks, _LANE), jnp.float32),
        grid_spec=pltpu.PrefetchScalarGridSpec(
            num_scalar_prefetch=0,
            grid=(n_blocks // tm,),
            in_specs=[
                # 16 folded coefficients in SMEM (scalar reads, no VMEM stream).
                pl.BlockSpec(memory_space=pltpu.MemorySpace.SMEM),
                # Point stream: dense per-channel (TM, 128) tiles.
                pl.BlockSpec((3, tm, _LANE), lambda i: (0, i, 0)),
            ],
            out_specs=pl.BlockSpec((4, tm, _LANE), lambda i: (0, i, 0)),
        ),
        # Default double-buffering is sufficient; add pipeline_mode=pl.Buffered(3)
        # on the point stream only if a trace shows exposed DMA.
        compiler_params=pltpu.CompilerParams(dimension_semantics=("parallel",)),
    )(coeffs, X)


@functools.partial(
    jax.jit, static_argnames=("tm", "n_pad", "image_height", "image_width"))
def _device_forward(lidar, coeffs, *, tm, n_pad, image_height, image_width):
    """Single-dispatch device path: fused pad + transpose + relayout, the
    projection kernel, and the live-column slice."""
    n = lidar.shape[0]
    lidar_p = jnp.pad(lidar.astype(jnp.float32), ((0, n_pad - n), (0, 0)))
    X = jnp.transpose(lidar_p).reshape(3, n_pad // _LANE, _LANE)
    out = _run_projection(coeffs, X, image_height, image_width, tm)
    return out.reshape(4, n_pad)[:, :n]


# ----------------------------------------------------------------------------
# wrapper: EulerModel.forward equivalent
# ----------------------------------------------------------------------------
def euler_model_forward(lidar_data, projection_matrix, image_height, image_width,
                        label_data, rot_param, translation_param, labels,
                        add_depth=True, depth_scaling_factor=1.0):
    lidar = jnp.asarray(lidar_data, jnp.float32)          # (N, 3)
    n = int(lidar.shape[0])
    tm = _choose_tm(n)
    step = tm * _LANE
    n_pad = ((n + step - 1) // step) * step

    # Fold extrinsics/projection/depth-scale into 16 scalars on the host.
    coeffs = jnp.asarray(_fold_coefficients(
        projection_matrix, rot_param, translation_param, depth_scaling_factor))

    out_dev = _device_forward(
        lidar, coeffs, tm=tm, n_pad=n_pad,
        image_height=int(image_height), image_width=int(image_width))
    out = np.asarray(jax.block_until_ready(out_dev))       # (4, N) live columns

    px, py, depth = out[0], out[1], out[2]
    fov = out[3] > 0.5
    label_np = np.asarray(label_data)

    # TODO(synk): boolean-mask filtering / per-label grouping produces dynamic
    # (ragged) shapes, so it stays on the host using the in-kernel fov mask.
    points_dict = {}
    for rel_label in labels:
        sel = fov & (label_np == rel_label)
        pos = np.stack([px[sel], py[sel]], axis=1)
        if add_depth:
            points_dict[rel_label] = np.concatenate(
                [pos, depth[sel][:, None]], axis=1)
        else:
            points_dict[rel_label] = pos
    return points_dict, (px, py, depth, fov)


# ----------------------------------------------------------------------------
# pure-numpy reference (mirrors the torch forward) for a sanity check
# ----------------------------------------------------------------------------
def _reference(lidar, P, H, W, rot_param, t, scale):
    R = euler_zyx_to_matrix(*rot_param)
    Tr = np.hstack([R, np.asarray(t, np.float32)[:, None]])
    hom = np.hstack([lidar, np.ones((len(lidar), 1), np.float32)])
    cam = hom @ Tr.T
    depth = cam[:, 2] * scale
    cam_hom = np.hstack([cam, np.ones((len(cam), 1), np.float32)])
    pts_hom = cam_hom @ np.asarray(P, np.float32).T
    pts = pts_hom[:, :2] / pts_hom[:, 2:3]
    fov = ((pts[:, 0] < W - 1) & (pts[:, 0] >= 0) &
           (pts[:, 1] < H - 1) & (pts[:, 1] >= 0) & (lidar[:, 0] > 2))
    return pts[:, 0], pts[:, 1], depth, fov


if __name__ == "__main__":
    key = jax.random.PRNGKey(0)
    k1, k2 = jax.random.split(key)

    N = 1000
    image_height, image_width = 480, 640
    depth_scaling_factor = 1.0
    labels = [1, 2, 3, 4]  # synthetic stand-in for LabelConfig.labels()

    # lidar points: x in [0, 60), y in [-20, 20), z in [1, 41)
    u = jax.random.uniform(k1, (N, 3), dtype=jnp.float32)
    lidar_data = u * jnp.array([60.0, 40.0, 40.0]) + jnp.array([0.0, -20.0, 1.0])
    label_data = jax.random.randint(k2, (N,), 1, 5)

    projection_matrix = jnp.array(
        [[500.0, 0.0, 320.0, 0.0],
         [0.0, 500.0, 240.0, 0.0],
         [0.0, 0.0, 1.0, 0.0]], dtype=jnp.float32)

    # deterministic "parameters" (module __init__ derives these from init_extrinsics)
    rot_param = np.array([0.05, -0.03, 0.02], np.float32)        # yaw, pitch, roll
    translation_param = np.array([0.2, -0.1, 0.5], np.float32)   # tx, ty, tz

    points_dict, (px, py, depth, fov) = euler_model_forward(
        lidar_data, projection_matrix, image_height, image_width, label_data,
        rot_param, translation_param, labels,
        add_depth=True, depth_scaling_factor=depth_scaling_factor)

    # sanity check against the numpy reference
    rpx, rpy, rdepth, rfov = _reference(
        np.asarray(lidar_data), np.asarray(projection_matrix),
        image_height, image_width, rot_param, translation_param,
        depth_scaling_factor)
    np.testing.assert_allclose(depth, rdepth, rtol=1e-4, atol=1e-4)
    good = np.abs(rdepth) > 0.5
    np.testing.assert_allclose(px[good], rpx[good], rtol=1e-3, atol=1e-2)
    np.testing.assert_allclose(py[good], rpy[good], rtol=1e-3, atol=1e-2)
    # fov must agree except for points sitting right on an image boundary
    margin = np.minimum.reduce([
        np.abs(rpx), np.abs(rpx - (image_width - 1)),
        np.abs(rpy), np.abs(rpy - (image_height - 1)),
        np.abs(np.asarray(lidar_data)[:, 0] - 2.0)])
    stable = margin > 0.1
    assert np.array_equal(fov[stable], rfov[stable])

    for lbl in labels:
        _ = points_dict[lbl].shape  # ragged per-label outputs exist

    print("KERNEL_OK")
</pallas_src>

<mosaic_0001>
module attributes {stable_mosaic.version = 11 : i64} {
  func.func @_project_kernel(%arg0: i32, %arg1: memref<16xf32, #tpu.memory_space<smem>>, %arg2: memref<3x8x128xf32, #tpu.memory_space<vmem>>, %arg3: memref<4x8x128xf32, #tpu.memory_space<vmem>>) attributes {dimension_semantics = [#tpu.dimension_semantics<parallel>], iteration_bounds = array<i64: 1>, scalar_prefetch = 0 : i64, scratch_operands = 0 : i64, tpu.core_type = #tpu.core_type<tc>, window_params = [{transform_indices = @transform_0, window_bounds = array<i64: 16>}, {transform_indices = @transform_1, window_bounds = array<i64: 3, 8, 128>}, {transform_indices = @transform_2, window_bounds = array<i64: 4, 8, 128>}]} {
    %c0 = arith.constant 0 : index
    %c0_0 = arith.constant 0 : index
    %c0_1 = arith.constant 0 : index
    %0 = vector.load %arg2[%c0, %c0_0, %c0_1] : memref<3x8x128xf32, #tpu.memory_space<vmem>>, vector<1x8x128xf32>
    %1 = vector.shape_cast %0 : vector<1x8x128xf32> to vector<8x128xf32>
    %c1 = arith.constant 1 : index
    %c0_2 = arith.constant 0 : index
    %c0_3 = arith.constant 0 : index
    %2 = vector.load %arg2[%c1, %c0_2, %c0_3] : memref<3x8x128xf32, #tpu.memory_space<vmem>>, vector<1x8x128xf32>
    %3 = vector.shape_cast %2 : vector<1x8x128xf32> to vector<8x128xf32>
    %c2 = arith.constant 2 : index
    %c0_4 = arith.constant 0 : index
    %c0_5 = arith.constant 0 : index
    %4 = vector.load %arg2[%c2, %c0_4, %c0_5] : memref<3x8x128xf32, #tpu.memory_space<vmem>>, vector<1x8x128xf32>
    %5 = vector.shape_cast %4 : vector<1x8x128xf32> to vector<8x128xf32>
    %c0_6 = arith.constant 0 : index
    %6 = memref.load %arg1[%c0_6] : memref<16xf32, #tpu.memory_space<smem>>
    %7 = vector.broadcast %6 : f32 to vector<8x128xf32>
    %8 = arith.mulf %7, %1 : vector<8x128xf32>
    %c1_7 = arith.constant 1 : index
    %9 = memref.load %arg1[%c1_7] : memref<16xf32, #tpu.memory_space<smem>>
    %10 = vector.broadcast %9 : f32 to vector<8x128xf32>
    %11 = arith.mulf %10, %3 : vector<8x128xf32>
    %12 = arith.addf %8, %11 : vector<8x128xf32>
    %c2_8 = arith.constant 2 : index
    %13 = memref.load %arg1[%c2_8] : memref<16xf32, #tpu.memory_space<smem>>
    %14 = vector.broadcast %13 : f32 to vector<8x128xf32>
    %15 = arith.mulf %14, %5 : vector<8x128xf32>
    %16 = arith.addf %12, %15 : vector<8x128xf32>
    %c3 = arith.constant 3 : index
    %17 = memref.load %arg1[%c3] : memref<16xf32, #tpu.memory_space<smem>>
    %18 = vector.broadcast %17 : f32 to vector<8x128xf32>
    %19 = arith.addf %16, %18 : vector<8x128xf32>
    %c4 = arith.constant 4 : index
    %20 = memref.load %arg1[%c4] : memref<16xf32, #tpu.memory_space<smem>>
    %21 = vector.broadcast %20 : f32 to vector<8x128xf32>
    %22 = arith.mulf %21, %1 : vector<8x128xf32>
    %c5 = arith.constant 5 : index
    %23 = memref.load %arg1[%c5] : memref<16xf32, #tpu.memory_space<smem>>
    %24 = vector.broadcast %23 : f32 to vector<8x128xf32>
    %25 = arith.mulf %24, %3 : vector<8x128xf32>
    %26 = arith.addf %22, %25 : vector<8x128xf32>
    %c6 = arith.constant 6 : index
    %27 = memref.load %arg1[%c6] : memref<16xf32, #tpu.memory_space<smem>>
    %28 = vector.broadcast %27 : f32 to vector<8x128xf32>
    %29 = arith.mulf %28, %5 : vector<8x128xf32>
    %30 = arith.addf %26, %29 : vector<8x128xf32>
    %c7 = arith.constant 7 : index
    %31 = memref.load %arg1[%c7] : memref<16xf32, #tpu.memory_space<smem>>
    %32 = vector.broadcast %31 : f32 to vector<8x128xf32>
    %33 = arith.addf %30, %32 : vector<8x128xf32>
    %c8 = arith.constant 8 : index
    %34 = memref.load %arg1[%c8] : memref<16xf32, #tpu.memory_space<smem>>
    %35 = vector.broadcast %34 : f32 to vector<8x128xf32>
    %36 = arith.mulf %35, %1 : vector<8x128xf32>
    %c9 = arith.constant 9 : index
    %37 = memref.load %arg1[%c9] : memref<16xf32, #tpu.memory_space<smem>>
    %38 = vector.broadcast %37 : f32 to vector<8x128xf32>
    %39 = arith.mulf %38, %3 : vector<8x128xf32>
    %40 = arith.addf %36, %39 : vector<8x128xf32>
    %c10 = arith.constant 10 : index
    %41 = memref.load %arg1[%c10] : memref<16xf32, #tpu.memory_space<smem>>
    %42 = vector.broadcast %41 : f32 to vector<8x128xf32>
    %43 = arith.mulf %42, %5 : vector<8x128xf32>
    %44 = arith.addf %40, %43 : vector<8x128xf32>
    %c11 = arith.constant 11 : index
    %45 = memref.load %arg1[%c11] : memref<16xf32, #tpu.memory_space<smem>>
    %46 = vector.broadcast %45 : f32 to vector<8x128xf32>
    %47 = arith.addf %44, %46 : vector<8x128xf32>
    %c12 = arith.constant 12 : index
    %48 = memref.load %arg1[%c12] : memref<16xf32, #tpu.memory_space<smem>>
    %49 = vector.broadcast %48 : f32 to vector<8x128xf32>
    %50 = arith.mulf %49, %1 : vector<8x128xf32>
    %c13 = arith.constant 13 : index
    %51 = memref.load %arg1[%c13] : memref<16xf32, #tpu.memory_space<smem>>
    %52 = vector.broadcast %51 : f32 to vector<8x128xf32>
    %53 = arith.mulf %52, %3 : vector<8x128xf32>
    %54 = arith.addf %50, %53 : vector<8x128xf32>
    %c14 = arith.constant 14 : index
    %55 = memref.load %arg1[%c14] : memref<16xf32, #tpu.memory_space<smem>>
    %56 = vector.broadcast %55 : f32 to vector<8x128xf32>
    %57 = arith.mulf %56, %5 : vector<8x128xf32>
    %58 = arith.addf %54, %57 : vector<8x128xf32>
    %c15 = arith.constant 15 : index
    %59 = memref.load %arg1[%c15] : memref<16xf32, #tpu.memory_space<smem>>
    %60 = vector.broadcast %59 : f32 to vector<8x128xf32>
    %61 = arith.addf %58, %60 : vector<8x128xf32>
    %62 = tpu.reciprocal %47 {approx = true} : vector<8x128xf32> -> vector<8x128xf32>
    %63 = arith.mulf %47, %62 : vector<8x128xf32>
    %cst = arith.constant 2.000000e+00 : f32
    %64 = vector.broadcast %cst : f32 to vector<8x128xf32>
    %65 = arith.subf %64, %63 : vector<8x128xf32>
    %66 = arith.mulf %62, %65 : vector<8x128xf32>
    %67 = arith.mulf %19, %66 : vector<8x128xf32>
    %68 = arith.mulf %33, %66 : vector<8x128xf32>
    %cst_9 = arith.constant 6.390000e+02 : f32
    %69 = vector.broadcast %cst_9 : f32 to vector<8x128xf32>
    %70 = arith.cmpf olt, %67, %69 : vector<8x128xf32>
    %cst_10 = arith.constant 0.000000e+00 : f32
    %71 = vector.broadcast %cst_10 : f32 to vector<8x128xf32>
    %72 = arith.cmpf oge, %67, %71 : vector<8x128xf32>
    %73 = arith.andi %70, %72 : vector<8x128xi1>
    %cst_11 = arith.constant 4.790000e+02 : f32
    %74 = vector.broadcast %cst_11 : f32 to vector<8x128xf32>
    %75 = arith.cmpf olt, %68, %74 : vector<8x128xf32>
    %76 = arith.andi %73, %75 : vector<8x128xi1>
    %cst_12 = arith.constant 0.000000e+00 : f32
    %77 = vector.broadcast %cst_12 : f32 to vector<8x128xf32>
    %78 = arith.cmpf oge, %68, %77 : vector<8x128xf32>
    %79 = arith.andi %76, %78 : vector<8x128xi1>
    %cst_13 = arith.constant 2.000000e+00 : f32
    %80 = vector.broadcast %cst_13 : f32 to vector<8x128xf32>
    %81 = arith.cmpf ogt, %1, %80 : vector<8x128xf32>
    %82 = arith.andi %79, %81 : vector<8x128xi1>
    %83 = arith.extui %82 : vector<8x128xi1> to vector<8x128xi32>
    %84 = arith.sitofp %83 : vector<8x128xi32> to vector<8x128xf32>
    %c0_14 = arith.constant 0 : index
    %c0_15 = arith.constant 0 : index
    %c0_16 = arith.constant 0 : index
    %85 = vector.load %arg3[%c0_14, %c0_15, %c0_16] : memref<4x8x128xf32, #tpu.memory_space<vmem>>, vector<1x8x128xf32>
    %86 = vector.shape_cast %85 : vector<1x8x128xf32> to vector<8x128xf32>
    %87 = vector.shape_cast %67 : vector<8x128xf32> to vector<1x8x128xf32>
    tpu.vector_store %arg3[%c0_14, %c0_15, %c0_16], %87 {strides = array<i32>} : memref<4x8x128xf32, #tpu.memory_space<vmem>>, vector<1x8x128xf32>,
    %c1_17 = arith.constant 1 : index
    %c0_18 = arith.constant 0 : index
    %c0_19 = arith.constant 0 : index
    %88 = vector.load %arg3[%c1_17, %c0_18, %c0_19] : memref<4x8x128xf32, #tpu.memory_space<vmem>>, vector<1x8x128xf32>
    %89 = vector.shape_cast %88 : vector<1x8x128xf32> to vector<8x128xf32>
    %90 = vector.shape_cast %68 : vector<8x128xf32> to vector<1x8x128xf32>
    tpu.vector_store %arg3[%c1_17, %c0_18, %c0_19], %90 {strides = array<i32>} : memref<4x8x128xf32, #tpu.memory_space<vmem>>, vector<1x8x128xf32>,
    %c2_20 = arith.constant 2 : index
    %c0_21 = arith.constant 0 : index
    %c0_22 = arith.constant 0 : index
    %91 = vector.load %arg3[%c2_20, %c0_21, %c0_22] : memref<4x8x128xf32, #tpu.memory_space<vmem>>, vector<1x8x128xf32>
    %92 = vector.shape_cast %91 : vector<1x8x128xf32> to vector<8x128xf32>
    %93 = vector.shape_cast %61 : vector<8x128xf32> to vector<1x8x128xf32>
    tpu.vector_store %arg3[%c2_20, %c0_21, %c0_22], %93 {strides = array<i32>} : memref<4x8x128xf32, #tpu.memory_space<vmem>>, vector<1x8x128xf32>,
    %c3_23 = arith.constant 3 : index
    %c0_24 = arith.constant 0 : index
    %c0_25 = arith.constant 0 : index
    %94 = vector.load %arg3[%c3_23, %c0_24, %c0_25] : memref<4x8x128xf32, #tpu.memory_space<vmem>>, vector<1x8x128xf32>
    %95 = vector.shape_cast %94 : vector<1x8x128xf32> to vector<8x128xf32>
    %96 = vector.shape_cast %84 : vector<8x128xf32> to vector<1x8x128xf32>
    tpu.vector_store %arg3[%c3_23, %c0_24, %c0_25], %96 {strides = array<i32>} : memref<4x8x128xf32, #tpu.memory_space<vmem>>, vector<1x8x128xf32>,
    return
  }
  func.func @transform_0(%arg0: i32) -> i32 {
    %c0_i32 = arith.constant 0 : i32
    %c0_i32_0 = arith.constant 0 : i32
    return %c0_i32 : i32
  }
  func.func @transform_1(%arg0: i32) -> (i32, i32, i32) {
    %c0_i32 = arith.constant 0 : i32
    %c0_i32_0 = arith.constant 0 : i32
    %c0_i32_1 = arith.constant 0 : i32
    return %c0_i32, %arg0, %c0_i32_0 : i32, i32, i32
  }
  func.func @transform_2(%arg0: i32) -> (i32, i32, i32) {
    %c0_i32 = arith.constant 0 : i32
    %c0_i32_0 = arith.constant 0 : i32
    %c0_i32_1 = arith.constant 0 : i32
    return %c0_i32, %arg0, %c0_i32_0 : i32, i32, i32
  }
}

</mosaic_0001>

<bundles_post_ra>
// kernel: _device_forward.1
= control target key start
LH: loop header
LB: loop body
LE: loop exit
PB: predicated region body
PF: predicated region fallthrough
CT: control target
= control target key end

     0   :  { %7 = vsyncpa [#allocation3], 0  ;;  %s213_s0 = inlined_call_operand.vmem [shape: f32[16], index: 0, kind: input, shape index: {}]   ;;  %s214_s1 = inlined_call_operand.vmem [shape: f32[3,8,128], index: 1, kind: input, shape index: {}]   ;;  %s215_s2 = inlined_call_operand.vmem [shape: f32[4,8,128], index: 2, kind: output, shape index: {}]  }
   0x1   :  { %s14_s11 = sshll.u32 %s213_s0, 4  ;;  %s15_s11 = int_to_ptr.vmem [resolvable:$true] %s14_s11 }
   0x2   :  { %s139_s12 = scalar_lea.vmem %s15_s11, 16  ;;  %p144_p1 = scmp.lt.s32.totalorder %s15_s11, %s15_s11 }
   0x3   :  { %p140_p0 = scmp.ne.s32.totalorder %s15_s11, %s139_s12  ;;  %p145_p2 = scmp.lt.s32.totalorder %s139_s12, %s139_s12 }
   0x5   :  { %p146_p3 = por %p145_p2, %p144_p1 }
   0x7   :  { %p147_p4 = pnand %p146_p3, %p140_p0 }
   0x9   :  { %150 = shalt.err (!%p147_p4)
}
   0xa   :  { %s153_s13 = smov [#allocation2]  }
   0xb   :  { %17 = dma.vmem_to_smem %s15_s11, 16, %s153_s13, [#allocation3]  }
   0xc   :  { %151 = dma.done.wait [#allocation3], 16  }
   0xd   :  { %152 = vsyncadd [#allocation3], 4294967280 }
   0xe   :  { %23 = sfence }
   0xf   :  { %s123_s14 = sld [smem:[#allocation2 + $0x8]]  ;;  %v176_v0 = vld [vmem:[%s214_s1] sm:$0xff]  ;;  %v114_v1 = vld [vmem:[%s214_s1 + $0x8] sm:$0xff]  ;;  %v115_v2 = vld [vmem:[%s214_s1 + $0x10] sm:$0xff]  ;;  %v154_v49 = vmov 0.0  }
  0x10   :  { %s124_s15 = sld [smem:[#allocation2 + $0x9]]  ;;  %vm98_vm5 = vcmp.gt.f32.partialorder %v176_v0, 2.0 }
  0x11   :  { %s125_s16 = sld [smem:[#allocation2 + $0xa]] }
  0x12   :  { %s126_s17 = sld [smem:[#allocation2 + $0xb]] }
  0x13   :  { %s178_s0 = sld [smem:[#allocation2]] }
  0x14   :  { %s183_s22 = sld [smem:[#allocation2 + $0x1]] }
  0x15   :  { %v58_v3 = vstv %s123_s14  ;;  %s188_s25 = sld [smem:[#allocation2 + $0x4]] }
  0x16   :  { %v59_v4 = vmul.f32 %v58_v3, %v176_v0  ;;  %v61_v5 = vstv %s124_s15  ;;  %s191_s26 = sld [smem:[#allocation2 + $0x5]] }
  0x17   :  { %v62_v6 = vmul.f32 %v114_v1, %v61_v5  ;;  %v65_v7 = vstv %s125_s16  ;;  %s127_s27 = sld [smem:[#allocation2 + $0xc]] }
  0x18   :  { %v66_v8 = vmul.f32 %v115_v2, %v65_v7  ;;  %s128_s28 = sld [smem:[#allocation2 + $0xd]]  ;;  %v69_v10 = vstv %s126_s17 }
  0x19   :  { %v63_v9 = vadd.f32 %v62_v6, %v59_v4  ;;  %s129_s29 = sld [smem:[#allocation2 + $0xe]]  ;;  %v30_v16 = vstv %s178_s0 }
  0x1a   :  { %s130_s1 = sld [smem:[#allocation2 + $0xf]]  ;;  %v33_v19 = vstv %s183_s22  ;;  %v31_v24 = vmul.f32 %v30_v16, %v176_v0 }
  0x1b   :  { %s117_s30 = sld [smem:[#allocation2 + $0x2]]  ;;  %v67_v11 = vadd.f32 %v66_v8, %v63_v9  ;;  %v44_v20 = vstv %s188_s25  ;;  %v34_v26 = vmul.f32 %v114_v1, %v33_v19 }
  0x1c   :  { %s121_s3 = sld [smem:[#allocation2 + $0x6]]  ;;  %v47_v21 = vstv %s191_s26  ;;  %v45_v27 = vmul.f32 %v44_v20, %v176_v0 }
  0x1d   :  { %v70_v12 = vadd.f32 %v69_v10, %v67_v11  ;;  %v72_v13 = vstv %s127_s27  ;;  %s118_s4 = sld [smem:[#allocation2 + $0x3]]  ;;  %v48_v28 = vmul.f32 %v114_v1, %v47_v21  ;;  %v35_v33 = vadd.f32 %v34_v26, %v31_v24 }
  0x1e   :  { %v73_v14 = vmul.f32 %v72_v13, %v176_v0  ;;  %v75_v15 = vstv %s128_s28  ;;  %s122_s5 = sld [smem:[#allocation2 + $0x7]] }
  0x1f   :  { %137 = vrcp.f32 %v70_v12  ;;  %v76_v17 = vmul.f32 %v114_v1, %v75_v15  ;;  %v79_v18 = vstv %s129_s29  ;;  %v49_v35 = vadd.f32 %v48_v28, %v45_v27 }
  0x20   :  { %v80_v22 = vmul.f32 %v115_v2, %v79_v18  ;;  %v83_v25 = vstv %s130_s1 }
  0x21   :  { %v77_v23 = vadd.f32 %v76_v17, %v73_v14  ;;  %v37_v30 = vstv %s117_s30 }
  0x22   :  { %v51_v31 = vstv %s121_s3  ;;  %v38_v34 = vmul.f32 %v115_v2, %v37_v30 }
  0x23   :  { %v81_v29 = vadd.f32 %v80_v22, %v77_v23  ;;  %v52_v36 = vmul.f32 %v115_v2, %v51_v31  ;;  %v41_v40 = vstv %s118_s4 }
  0x24   :  { %v39_v37 = vadd.f32 %v38_v34, %v35_v33  ;;  %v55_v41 = vstv %s122_s5 }
  0x25   :  { %v84_v32 = vadd.f32 %v83_v25, %v81_v29  ;;  %v53_v38 = vadd.f32 %v52_v36, %v49_v35 }
  0x26   :  { %v42_v43 = vadd.f32 %v41_v40, %v39_v37 }
  0x27   :  { %133 = vst [vmem:[%s215_s2 + $0x10] sm:$0xff] %v84_v32  ;;  %v56_v45 = vadd.f32 %v55_v41, %v53_v38 }
  0x2c   :  { %v138_v39 = vpop.eup %137 }
  0x2d   :  { %v86_v42 = vmul.f32 %v138_v39, %v70_v12 }
  0x2f   :  { %v87_v44 = vsub.f32 2.0, %v86_v42 }
  0x31   :  { %v88_v46 = vmul.f32 %v138_v39, %v87_v44 }
  0x33   :  { %v89_v47 = vmul.f32 %v88_v46, %v42_v43  ;;  %v90_v48 = vmul.f32 %v88_v46, %v56_v45 }
  0x35   :  { %102 = vst [vmem:[%s215_s2] sm:$0xff] %v89_v47  ;;  %132 = vst [vmem:[%s215_s2 + $0x8] sm:$0xff] %v90_v48  ;;  %vm91_vm0 = vcmp.lt.f32.partialorder %v89_v47, 639.0  ;;  %vm92_vm1 = vcmp.ge.f32.partialorder %v89_v47, 0.0  ;;  %vm94_vm2 = vcmp.lt.f32.partialorder %v90_v48, 479.0  ;;  %vm96_vm3 = vcmp.ge.f32.partialorder %v90_v48, 0.0 }
  0x36   :  { %vm93_vm4 = vmand %vm91_vm0, %vm92_vm1 }
  0x37   :  { %vm95_vm6 = vmand %vm93_vm4, %vm94_vm2 }
  0x38   :  { %vm97_vm7 = vmand %vm95_vm6, %vm96_vm3 }
  0x39   :  { %vm99_vm8 = vmand %vm97_vm7, %vm98_vm5 }
  0x3a   :  { %v131_v50 = vsel %vm99_vm8, 1.0, %v154_v49 }
  0x3b   :  { %134 = vst [vmem:[%s215_s2 + $0x18] sm:$0xff] %v131_v50 }
  0x3c   :  { %113 = vsyncpa [#allocation3], 1 }

</bundles_post_ra>
